<compile_context>
chip_gen: v6e
topology: v6e:2x2x1
jax: 0.10.0
libtpu: 0.0.40
codegen_flags: <defaults>
</compile_context>

<pallas_src>
import math
from functools import partial

import numpy as np
import jax
import jax.numpy as jnp
from jax import lax
from jax.experimental import pallas as pl
from jax.experimental.pallas import tpu as pltpu


_KRON_CHANNEL_BUDGET = 16  # use the fused kron path only when C_in * C_out <= this


# ----------------------------------------------------------------------------
# Host-side interpolation-matrix builders (mirror PyTorch F.interpolate with a
# scale_factor: coordinate scale = 1/scale_factor, align_corners=False).
# ----------------------------------------------------------------------------
def _output_size(in_size: int, scale_factor: float) -> int:
    return int(math.floor(in_size * scale_factor))


def _resize_matrix(in_size: int, out_size: int, scale_factor: float, method: str):
    scale = (1.0 / scale_factor) if scale_factor > 0 else float(in_size) / out_size
    A = np.zeros((out_size, in_size), dtype=np.float32)
    if method == "nearest":
        for d in range(out_size):
            s = min(int(math.floor(d * scale)), in_size - 1)
            A[d, s] = 1.0
    elif method == "bilinear":
        for d in range(out_size):
            src = max(scale * (d + 0.5) - 0.5, 0.0)
            x0 = min(int(math.floor(src)), in_size - 1)
            x1 = min(x0 + 1, in_size - 1)
            lam = src - x0
            A[d, x0] += 1.0 - lam
            A[d, x1] += lam
    else:
        # TODO(synk): bicubic / area / linear / trilinear weight matrices not implemented.
        raise NotImplementedError(f"method {method!r} not implemented")
    return A


def _composed_resize_matrix(size0: int, n_stages: int, multiplier: float, method: str):
    """Compose the per-stage 1-D interpolation operators into one matrix."""
    A = np.eye(size0, dtype=np.float32)
    s = size0
    for _ in range(n_stages):
        s_out = _output_size(s, multiplier)
        A = _resize_matrix(s, s_out, multiplier, method) @ A
        s = s_out
    return A  # (final_size, size0)


# ----------------------------------------------------------------------------
# Generation-aware scoped-VMEM limit.
# ----------------------------------------------------------------------------
def _vmem_limit_bytes(needed: int) -> int:
    try:
        cap = int(pltpu.get_tpu_info().vmem_capacity_bytes)
    except Exception:
        cap = 128 * 1024 * 1024
    ceiling = (cap * 3) // 4            # ~48 MiB on v7x, ~96 MiB on v5e/v6e
    return int(min(ceiling, max(32 * 1024 * 1024, int(needed))))


# ----------------------------------------------------------------------------
# Path A: fused kron kernel (small C_in*C_out): resize (all stages) + 1x1 conv
# in two big 2-D matmuls, one HBM read and one HBM write.
# ----------------------------------------------------------------------------
def _fused_kron_kernel(use_bias, x_ref, awt_ref, m_ref, *rest):
    # x_ref:   (1, C_in*H_in, W_in)       one batch element
    # awt_ref: (W_in, tile_w)             composed W-interp matrix (transposed), W tile
    # m_ref:   (C_out*H_out, C_in*H_in)   kron(channel_map, composed H-interp)
    # b_ref:   (C_out*H_out, 1) f32       bias repeated over H_out (only if use_bias)
    # o_ref:   (1, C_out*H_out, tile_w)
    if use_bias:
        b_ref, o_ref = rest
    else:
        (o_ref,) = rest
    cdt = awt_ref.dtype
    x = x_ref[0].astype(cdt)                                       # (C*H_in, W_in)
    t = jnp.dot(x, awt_ref[...], preferred_element_type=jnp.float32).astype(cdt)
    y = jnp.dot(m_ref[...], t, preferred_element_type=jnp.float32)
    if use_bias:
        y = y + b_ref[...]
    o_ref[0] = y.astype(o_ref.dtype)


def _fused_rescale(x2, awt, m, bias, use_bias):
    # x2: (N, C_in*H_in, W_in); awt: (W_in, W_out); m: (CH_out, CH_in); bias: (CH_out, 1)|None
    N, ch_in, w_in = x2.shape
    w_out = awt.shape[1]
    ch_out = m.shape[0]
    tile_w = w_out if w_out <= 512 else 512                        # 512 % 128 == 0
    num_w = int(pl.cdiv(w_out, tile_w))

    in_specs = [
        pl.BlockSpec((1, ch_in, w_in), lambda n, j: (n, 0, 0)),    # constant across j: no re-DMA
        pl.BlockSpec((w_in, tile_w), lambda n, j: (0, j)),
        pl.BlockSpec((ch_out, ch_in), lambda n, j: (0, 0)),
    ]
    operands = [x2, awt, m]
    if use_bias:
        in_specs.append(pl.BlockSpec((ch_out, 1), lambda n, j: (0, 0)))
        operands.append(bias)

    ex = jnp.dtype(x2.dtype).itemsize
    ec = jnp.dtype(awt.dtype).itemsize
    needed = (2 * (ch_in * w_in + ch_out * tile_w) * ex            # double-buffered x / out blocks
              + 2 * ((w_in * tile_w + ch_out * ch_in) * ec + ch_out * 4)  # constants (2 bufs each)
              + 2 * (ch_in * tile_w + ch_out * tile_w) * 4         # f32 intermediates
              + (2 << 20))
    flops = 2 * N * w_out * ch_in * (w_in + ch_out)
    nbytes = (x2.size * ex + awt.size * ec + m.size * ec
              + N * ch_out * w_out * ex + (ch_out * 4 if use_bias else 0))

    return pl.pallas_call(
        partial(_fused_kron_kernel, use_bias),
        out_shape=jax.ShapeDtypeStruct((N, ch_out, w_out), x2.dtype),
        grid=(N, num_w),
        in_specs=in_specs,
        out_specs=pl.BlockSpec((1, ch_out, tile_w), lambda n, j: (n, 0, j)),
        compiler_params=pltpu.CompilerParams(
            dimension_semantics=("parallel", "parallel"),
            vmem_limit_bytes=_vmem_limit_bytes(needed)),
        cost_estimate=pl.CostEstimate(flops=int(flops), transcendentals=0,
                                      bytes_accessed=int(nbytes)),
    )(*operands)


# ----------------------------------------------------------------------------
# Path B, stage 1: per-channel spatial resize (no Kronecker redundancy).
# ----------------------------------------------------------------------------
def _resize_kernel(n_channels, x_ref, ah_ref, awt_ref, o_ref):
    # x_ref: (C, H_in, W_in); ah_ref: (H_out, H_in); awt_ref: (W_in, tile_w)
    # o_ref: (C, H_out, tile_w)
    cdt = awt_ref.dtype

    def one_channel(c):
        plane = x_ref[c].astype(cdt)                               # (H_in, W_in)
        t = jnp.dot(plane, awt_ref[...], preferred_element_type=jnp.float32).astype(cdt)
        z = jnp.dot(ah_ref[...], t, preferred_element_type=jnp.float32)
        o_ref[c] = z.astype(o_ref.dtype)

    if n_channels <= 32:
        for c in range(n_channels):                                # static unroll: LLO visibility
            one_channel(c)
    else:
        def body(c, carry):
            one_channel(c)
            return carry
        lax.fori_loop(0, n_channels, body, 0)


def _resize_per_channel(x, ah, awt):
    # x: (N, C, H_in, W_in) NCHW
    N, C, h_in, w_in = x.shape
    h_out = ah.shape[0]
    w_out = awt.shape[1]
    tile_w = w_out if w_out <= 512 else 512
    num_w = int(pl.cdiv(w_out, tile_w))

    ex = jnp.dtype(x.dtype).itemsize
    ec = jnp.dtype(awt.dtype).itemsize
    needed = (2 * C * (h_in * w_in + h_out * tile_w) * ex
              + 2 * (h_out * h_in + w_in * tile_w) * ec
              + 4 * (h_in + h_out) * tile_w * 4
              + (2 << 20))
    flops = 2 * N * C * h_in * w_out * (w_in + h_out)
    nbytes = x.size * ex + ah.size * ec + awt.size * ec + N * C * h_out * w_out * ex

    return pl.pallas_call(
        partial(_resize_kernel, C),
        out_shape=jax.ShapeDtypeStruct((N, C, h_out, w_out), x.dtype),
        grid=(N, num_w),
        in_specs=[
            pl.BlockSpec((None, C, h_in, w_in), lambda n, j: (n, 0, 0, 0)),
            pl.BlockSpec((h_out, h_in), lambda n, j: (0, 0)),
            pl.BlockSpec((w_in, tile_w), lambda n, j: (0, j)),
        ],
        out_specs=pl.BlockSpec((None, C, h_out, tile_w), lambda n, j: (n, 0, 0, j)),
        compiler_params=pltpu.CompilerParams(
            dimension_semantics=("parallel", "parallel"),
            vmem_limit_bytes=_vmem_limit_bytes(needed)),
        cost_estimate=pl.CostEstimate(flops=int(flops), transcendentals=0,
                                      bytes_accessed=int(nbytes)),
    )(x, ah, awt)


# ----------------------------------------------------------------------------
# Path B, stage 2: lane-dense 1x1-conv channel mix on the downsampled tensor.
# ----------------------------------------------------------------------------
def _channel_mix_kernel(use_bias, z_ref, w_ref, *rest):
    # z_ref: (1, C_in, tile_hw); w_ref: (C_out, C_in); b_ref: (C_out, 1) f32
    # o_ref: (1, C_out, tile_hw)    -- matmul N-dim = tile_hw (lane dense)
    if use_bias:
        b_ref, o_ref = rest
    else:
        (o_ref,) = rest
    cdt = w_ref.dtype
    z = z_ref[0].astype(cdt)
    y = jnp.dot(w_ref[...], z, preferred_element_type=jnp.float32)
    if use_bias:
        y = y + b_ref[...]
    o_ref[0] = y.astype(o_ref.dtype)


def _channel_mix(z3, w_map, bias, use_bias):
    # z3: (N, C_in, H_out*W_out); w_map: (C_out, C_in); bias: (C_out, 1) f32 | None
    N, c_in, hw = z3.shape
    c_out = w_map.shape[0]
    tile_hw = hw if hw <= 8192 else 8192                           # 8192 % 128 == 0
    num_hw = int(pl.cdiv(hw, tile_hw))

    ez = jnp.dtype(z3.dtype).itemsize
    ec = jnp.dtype(w_map.dtype).itemsize
    needed = (2 * (c_in + c_out) * tile_hw * ez
              + 2 * (c_out * c_in * ec + c_out * 4)
              + 2 * c_out * tile_hw * 4
              + (2 << 20))
    flops = 2 * N * c_out * c_in * hw
    nbytes = (z3.size * ez + w_map.size * ec + N * c_out * hw * ez
              + (c_out * 4 if use_bias else 0))

    in_specs = [
        pl.BlockSpec((1, c_in, tile_hw), lambda n, j: (n, 0, j)),
        pl.BlockSpec((c_out, c_in), lambda n, j: (0, 0)),
    ]
    operands = [z3, w_map]
    if use_bias:
        in_specs.append(pl.BlockSpec((c_out, 1), lambda n, j: (0, 0)))
        operands.append(bias)

    return pl.pallas_call(
        partial(_channel_mix_kernel, use_bias),
        out_shape=jax.ShapeDtypeStruct((N, c_out, hw), z3.dtype),
        grid=(N, num_hw),
        in_specs=in_specs,
        out_specs=pl.BlockSpec((1, c_out, tile_hw), lambda n, j: (n, 0, j)),
        compiler_params=pltpu.CompilerParams(
            dimension_semantics=("parallel", "parallel"),
            vmem_limit_bytes=_vmem_limit_bytes(needed)),
        cost_estimate=pl.CostEstimate(flops=int(flops), transcendentals=0,
                                      bytes_accessed=int(nbytes)),
    )(*operands)


# ----------------------------------------------------------------------------
# Module
# ----------------------------------------------------------------------------
class SpatialRescalerPallas:
    def __init__(self, n_stages=1, method="bilinear", multiplier=0.5,
                 in_channels=3, out_channels=None, bias=False, key=None,
                 compute_dtype=None):
        assert n_stages >= 0
        assert method in ["nearest", "linear", "bilinear", "trilinear", "bicubic", "area"]
        self.n_stages = n_stages
        self.method = method
        self.multiplier = multiplier
        self.in_channels = in_channels
        self.out_channels = out_channels
        self.remap_output = out_channels is not None
        self.use_bias = bool(bias) and self.remap_output
        self.compute_dtype = compute_dtype     # e.g. jnp.bfloat16 (opt-in, changes numerics)
        self.weight = None
        self.bias = None
        self._cache = {}                        # (C, H, W, dtype) -> prepared device operands
        if self.remap_output:
            # Deterministic init matching nn.Conv2d defaults (bound = 1/sqrt(fan_in)).
            key = jax.random.PRNGKey(0) if key is None else key
            kw, kb = jax.random.split(key)
            bound = 1.0 / math.sqrt(in_channels)
            self.weight = jax.random.uniform(
                kw, (out_channels, in_channels), jnp.float32, -bound, bound)
            if self.use_bias:
                self.bias = jax.random.uniform(
                    kb, (out_channels,), jnp.float32, -bound, bound)

    # ------------------------------------------------------------------
    def _prepare(self, C, H, W, dt):
        key = (C, H, W, jnp.dtype(dt).name)
        if key in self._cache:
            return self._cache[key]
        cdt = jnp.dtype(self.compute_dtype) if self.compute_dtype is not None else jnp.dtype(dt)
        c_out = self.out_channels if self.remap_output else C

        if self.n_stages > 0:
            a_h = _composed_resize_matrix(H, self.n_stages, self.multiplier, self.method)
            a_w = _composed_resize_matrix(W, self.n_stages, self.multiplier, self.method)
        else:
            a_h = np.eye(H, dtype=np.float32)
            a_w = np.eye(W, dtype=np.float32)
        h_out, w_out = a_h.shape[0], a_w.shape[0]

        fused = self.n_stages > 0 and (C * c_out) <= _KRON_CHANNEL_BUDGET
        p = {"h_out": h_out, "w_out": w_out, "c_out": c_out, "fused": fused,
             "awt": jnp.asarray(a_w.T, dtype=cdt)}

        if fused:
            if self.remap_output:
                wmat = np.asarray(self.weight, dtype=np.float32)
            else:
                wmat = np.eye(C, dtype=np.float32)
            p["m"] = jnp.asarray(np.kron(wmat, a_h), dtype=cdt)
            p["b_rep"] = (jnp.repeat(self.bias, h_out).reshape(c_out * h_out, 1)
                          .astype(jnp.float32) if self.use_bias else None)
        else:
            p["ah"] = jnp.asarray(a_h, dtype=cdt)
            if self.remap_output:
                p["w_map"] = jnp.asarray(self.weight, dtype=cdt)
                p["b_mix"] = (jnp.asarray(self.bias, jnp.float32).reshape(c_out, 1)
                              if self.use_bias else None)
        self._cache[key] = p
        return p

    # ------------------------------------------------------------------
    def __call__(self, x):
        # x: (N, C, H, W) -- NCHW, like PyTorch.
        N, C, H, W = x.shape
        if self.remap_output:
            assert C == self.in_channels
        if self.n_stages == 0 and not self.remap_output:
            return x

        p = self._prepare(C, H, W, x.dtype)
        h_out, w_out, c_out = p["h_out"], p["w_out"], p["c_out"]

        if self.n_stages == 0:
            # remap only (identity resize): single lane-dense channel-mix kernel.
            z3 = x.reshape(N, C, H * W)
            y = _channel_mix(z3, p["w_map"], p["b_mix"], self.use_bias)
            return y.reshape(N, c_out, H, W)

        if p["fused"]:
            # Small-channel case: single fused kernel (one HBM read, one write).
            x2 = x.reshape(N, C * H, W)                 # free contiguous reshape of NCHW
            y = _fused_rescale(x2, p["awt"], p["m"], p["b_rep"], self.use_bias)
            return y.reshape(N, c_out, h_out, w_out)

        # Factored path: per-channel resize, then (optionally) lane-dense channel mix on the
        # (already downsampled, so cheap to round-trip) intermediate.
        z = _resize_per_channel(x, p["ah"], p["awt"])   # (N, C, h_out, w_out)
        if not self.remap_output:
            return z
        z3 = z.reshape(N, C, h_out * w_out)             # free contiguous reshape
        y = _channel_mix(z3, p["w_map"], p["b_mix"], self.use_bias)
        return y.reshape(N, c_out, h_out, w_out)

    def encode(self, x):
        return self(x)


# ----------------------------------------------------------------------------
# Demo / self-check (exercises the factored path, the fused kron path with and
# without channel remap, and a bf16-input tolerance test).
# ----------------------------------------------------------------------------
if __name__ == "__main__":
    key = jax.random.PRNGKey(0)
    kx, kp, kx2, kp2 = jax.random.split(key, 4)

    # -- Config 1: C_in*C_out = 32 > 16 -> factored path (resize kernel + channel-mix kernel).
    N, C_in, H, W = 2, 4, 16, 16
    C_out = 8
    x = jax.random.normal(kx, (N, C_in, H, W), dtype=jnp.float32)
    model = SpatialRescalerPallas(n_stages=1, method="bilinear", multiplier=0.5,
                                  in_channels=C_in, out_channels=C_out, bias=True, key=kp)
    out = jax.block_until_ready(model(x))
    assert out.shape == (N, C_out, H // 2, W // 2), out.shape

    A_h = jnp.asarray(_composed_resize_matrix(H, 1, 0.5, "bilinear"))
    A_w = jnp.asarray(_composed_resize_matrix(W, 1, 0.5, "bilinear"))
    ref = jnp.einsum("Hh,nchw,Ww->ncHW", A_h, x, A_w)
    ref = jnp.einsum("oc,nchw->nohw", model.weight, ref) + model.bias.reshape(1, -1, 1, 1)
    np.testing.assert_allclose(np.asarray(out), np.asarray(ref), rtol=1e-4, atol=1e-4)

    # -- Config 1b: bf16 input through the same factored path (looser tolerance).
    xb = x.astype(jnp.bfloat16)
    outb = jax.block_until_ready(model(xb))
    refb = jnp.einsum("Hh,nchw,Ww->ncHW", A_h, xb.astype(jnp.float32), A_w)
    refb = jnp.einsum("oc,nchw->nohw", model.weight, refb) + model.bias.reshape(1, -1, 1, 1)
    np.testing.assert_allclose(np.asarray(outb).astype(np.float32), np.asarray(refb),
                               rtol=5e-2, atol=5e-2)

    # -- Config 2: C_in*C_out = 12 <= 16 -> fused kron path, 2 stages, with bias.
    N2, C2_in, H2, W2 = 1, 3, 16, 16
    C2_out = 4
    x2 = jax.random.normal(kx2, (N2, C2_in, H2, W2), dtype=jnp.float32)
    model2 = SpatialRescalerPallas(n_stages=2, method="bilinear", multiplier=0.5,
                                   in_channels=C2_in, out_channels=C2_out, bias=True, key=kp2)
    out2 = jax.block_until_ready(model2(x2))
    assert out2.shape == (N2, C2_out, 4, 4), out2.shape
    A_h2 = jnp.asarray(_composed_resize_matrix(H2, 2, 0.5, "bilinear"))
    A_w2 = jnp.asarray(_composed_resize_matrix(W2, 2, 0.5, "bilinear"))
    ref2 = jnp.einsum("Hh,nchw,Ww->ncHW", A_h2, x2, A_w2)
    ref2 = jnp.einsum("oc,nchw->nohw", model2.weight, ref2) + model2.bias.reshape(1, -1, 1, 1)
    np.testing.assert_allclose(np.asarray(out2), np.asarray(ref2), rtol=1e-4, atol=1e-4)

    # -- Config 3: no channel remap, small C -> fused block-diagonal path, nearest.
    model3 = SpatialRescalerPallas(n_stages=1, method="nearest", multiplier=0.5, in_channels=3)
    out3 = jax.block_until_ready(model3(x2))
    assert out3.shape == (N2, C2_in, 8, 8), out3.shape
    A_h3 = jnp.asarray(_composed_resize_matrix(H2, 1, 0.5, "nearest"))
    A_w3 = jnp.asarray(_composed_resize_matrix(W2, 1, 0.5, "nearest"))
    ref3 = jnp.einsum("Hh,nchw,Ww->ncHW", A_h3, x2, A_w3)
    np.testing.assert_allclose(np.asarray(out3), np.asarray(ref3), rtol=1e-5, atol=1e-5)

    print("KERNEL_OK")
</pallas_src>

<mosaic_0001>
module attributes {stable_mosaic.version = 11 : i64} {
  func.func @_resize_kernel(%arg0: i32, %arg1: i32, %arg2: memref<1x4x16x16xf32, #tpu.memory_space<vmem>>, %arg3: memref<8x16xf32, #tpu.memory_space<vmem>>, %arg4: memref<16x8xf32, #tpu.memory_space<vmem>>, %arg5: memref<1x4x8x8xf32, #tpu.memory_space<vmem>>) attributes {dimension_semantics = [#tpu.dimension_semantics<parallel>, #tpu.dimension_semantics<parallel>], iteration_bounds = array<i64: 2, 1>, scalar_prefetch = 0 : i64, scratch_operands = 0 : i64, tpu.core_type = #tpu.core_type<tc>, window_params = [{transform_indices = @transform_0, window_bounds = array<i64: 1, 4, 16, 16>}, {pipeline_mode = #tpu.pipeline_mode<synchronous>, transform_indices = @transform_1, window_bounds = array<i64: 8, 16>}, {transform_indices = @transform_2, window_bounds = array<i64: 16, 8>}, {transform_indices = @transform_3, window_bounds = array<i64: 1, 4, 8, 8>}]} {
    %c0 = arith.constant 0 : index
    %c0_0 = arith.constant 0 : index
    %c0_1 = arith.constant 0 : index
    %c0_2 = arith.constant 0 : index
    %0 = vector.load %arg2[%c0, %c0_0, %c0_1, %c0_2] : memref<1x4x16x16xf32, #tpu.memory_space<vmem>>, vector<1x1x16x16xf32>
    %1 = vector.shape_cast %0 : vector<1x1x16x16xf32> to vector<16x16xf32>
    %c0_3 = arith.constant 0 : index
    %c0_4 = arith.constant 0 : index
    %2 = vector.load %arg4[%c0_3, %c0_4] : memref<16x8xf32, #tpu.memory_space<vmem>>, vector<16x8xf32>
    %cst = arith.constant dense<0.000000e+00> : vector<16x8xf32>
    %3 = tpu.matmul %1, %2, %cst {dimension_numbers = #tpu.dot_dimension_numbers<[1], [0], [0], [1], [0, 0, 1, 1], [], []>} : vector<16x16xf32>, vector<16x8xf32>, vector<16x8xf32> -> vector<16x8xf32>
    %c0_5 = arith.constant 0 : index
    %c0_6 = arith.constant 0 : index
    %4 = vector.load %arg3[%c0_5, %c0_6] : memref<8x16xf32, #tpu.memory_space<vmem>>, vector<8x16xf32>
    %cst_7 = arith.constant dense<0.000000e+00> : vector<8x8xf32>
    %5 = tpu.matmul %4, %3, %cst_7 {dimension_numbers = #tpu.dot_dimension_numbers<[1], [0], [0], [1], [0, 0, 1, 1], [], []>} : vector<8x16xf32>, vector<16x8xf32>, vector<8x8xf32> -> vector<8x8xf32>
    %c0_8 = arith.constant 0 : index
    %c0_9 = arith.constant 0 : index
    %c0_10 = arith.constant 0 : index
    %c0_11 = arith.constant 0 : index
    %6 = vector.load %arg5[%c0_8, %c0_9, %c0_10, %c0_11] : memref<1x4x8x8xf32, #tpu.memory_space<vmem>>, vector<1x1x8x8xf32>
    %7 = vector.shape_cast %6 : vector<1x1x8x8xf32> to vector<8x8xf32>
    %8 = vector.shape_cast %5 : vector<8x8xf32> to vector<1x1x8x8xf32>
    tpu.vector_store %arg5[%c0_8, %c0_9, %c0_10, %c0_11], %8 {strides = array<i32>} : memref<1x4x8x8xf32, #tpu.memory_space<vmem>>, vector<1x1x8x8xf32>,
    %c0_12 = arith.constant 0 : index
    %c1 = arith.constant 1 : index
    %c0_13 = arith.constant 0 : index
    %c0_14 = arith.constant 0 : index
    %9 = vector.load %arg2[%c0_12, %c1, %c0_13, %c0_14] : memref<1x4x16x16xf32, #tpu.memory_space<vmem>>, vector<1x1x16x16xf32>
    %10 = vector.shape_cast %9 : vector<1x1x16x16xf32> to vector<16x16xf32>
    %c0_15 = arith.constant 0 : index
    %c0_16 = arith.constant 0 : index
    %11 = vector.load %arg4[%c0_15, %c0_16] : memref<16x8xf32, #tpu.memory_space<vmem>>, vector<16x8xf32>
    %cst_17 = arith.constant dense<0.000000e+00> : vector<16x8xf32>
    %12 = tpu.matmul %10, %11, %cst_17 {dimension_numbers = #tpu.dot_dimension_numbers<[1], [0], [0], [1], [0, 0, 1, 1], [], []>} : vector<16x16xf32>, vector<16x8xf32>, vector<16x8xf32> -> vector<16x8xf32>
    %c0_18 = arith.constant 0 : index
    %c0_19 = arith.constant 0 : index
    %13 = vector.load %arg3[%c0_18, %c0_19] : memref<8x16xf32, #tpu.memory_space<vmem>>, vector<8x16xf32>
    %cst_20 = arith.constant dense<0.000000e+00> : vector<8x8xf32>
    %14 = tpu.matmul %13, %12, %cst_20 {dimension_numbers = #tpu.dot_dimension_numbers<[1], [0], [0], [1], [0, 0, 1, 1], [], []>} : vector<8x16xf32>, vector<16x8xf32>, vector<8x8xf32> -> vector<8x8xf32>
    %c0_21 = arith.constant 0 : index
    %c1_22 = arith.constant 1 : index
    %c0_23 = arith.constant 0 : index
    %c0_24 = arith.constant 0 : index
    %15 = vector.load %arg5[%c0_21, %c1_22, %c0_23, %c0_24] : memref<1x4x8x8xf32, #tpu.memory_space<vmem>>, vector<1x1x8x8xf32>
    %16 = vector.shape_cast %15 : vector<1x1x8x8xf32> to vector<8x8xf32>
    %17 = vector.shape_cast %14 : vector<8x8xf32> to vector<1x1x8x8xf32>
    tpu.vector_store %arg5[%c0_21, %c1_22, %c0_23, %c0_24], %17 {strides = array<i32>} : memref<1x4x8x8xf32, #tpu.memory_space<vmem>>, vector<1x1x8x8xf32>,
    %c0_25 = arith.constant 0 : index
    %c2 = arith.constant 2 : index
    %c0_26 = arith.constant 0 : index
    %c0_27 = arith.constant 0 : index
    %18 = vector.load %arg2[%c0_25, %c2, %c0_26, %c0_27] : memref<1x4x16x16xf32, #tpu.memory_space<vmem>>, vector<1x1x16x16xf32>
    %19 = vector.shape_cast %18 : vector<1x1x16x16xf32> to vector<16x16xf32>
    %c0_28 = arith.constant 0 : index
    %c0_29 = arith.constant 0 : index
    %20 = vector.load %arg4[%c0_28, %c0_29] : memref<16x8xf32, #tpu.memory_space<vmem>>, vector<16x8xf32>
    %cst_30 = arith.constant dense<0.000000e+00> : vector<16x8xf32>
    %21 = tpu.matmul %19, %20, %cst_30 {dimension_numbers = #tpu.dot_dimension_numbers<[1], [0], [0], [1], [0, 0, 1, 1], [], []>} : vector<16x16xf32>, vector<16x8xf32>, vector<16x8xf32> -> vector<16x8xf32>
    %c0_31 = arith.constant 0 : index
    %c0_32 = arith.constant 0 : index
    %22 = vector.load %arg3[%c0_31, %c0_32] : memref<8x16xf32, #tpu.memory_space<vmem>>, vector<8x16xf32>
    %cst_33 = arith.constant dense<0.000000e+00> : vector<8x8xf32>
    %23 = tpu.matmul %22, %21, %cst_33 {dimension_numbers = #tpu.dot_dimension_numbers<[1], [0], [0], [1], [0, 0, 1, 1], [], []>} : vector<8x16xf32>, vector<16x8xf32>, vector<8x8xf32> -> vector<8x8xf32>
    %c0_34 = arith.constant 0 : index
    %c2_35 = arith.constant 2 : index
    %c0_36 = arith.constant 0 : index
    %c0_37 = arith.constant 0 : index
    %24 = vector.load %arg5[%c0_34, %c2_35, %c0_36, %c0_37] : memref<1x4x8x8xf32, #tpu.memory_space<vmem>>, vector<1x1x8x8xf32>
    %25 = vector.shape_cast %24 : vector<1x1x8x8xf32> to vector<8x8xf32>
    %26 = vector.shape_cast %23 : vector<8x8xf32> to vector<1x1x8x8xf32>
    tpu.vector_store %arg5[%c0_34, %c2_35, %c0_36, %c0_37], %26 {strides = array<i32>} : memref<1x4x8x8xf32, #tpu.memory_space<vmem>>, vector<1x1x8x8xf32>,
    %c0_38 = arith.constant 0 : index
    %c3 = arith.constant 3 : index
    %c0_39 = arith.constant 0 : index
    %c0_40 = arith.constant 0 : index
    %27 = vector.load %arg2[%c0_38, %c3, %c0_39, %c0_40] : memref<1x4x16x16xf32, #tpu.memory_space<vmem>>, vector<1x1x16x16xf32>
    %28 = vector.shape_cast %27 : vector<1x1x16x16xf32> to vector<16x16xf32>
    %c0_41 = arith.constant 0 : index
    %c0_42 = arith.constant 0 : index
    %29 = vector.load %arg4[%c0_41, %c0_42] : memref<16x8xf32, #tpu.memory_space<vmem>>, vector<16x8xf32>
    %cst_43 = arith.constant dense<0.000000e+00> : vector<16x8xf32>
    %30 = tpu.matmul %28, %29, %cst_43 {dimension_numbers = #tpu.dot_dimension_numbers<[1], [0], [0], [1], [0, 0, 1, 1], [], []>} : vector<16x16xf32>, vector<16x8xf32>, vector<16x8xf32> -> vector<16x8xf32>
    %c0_44 = arith.constant 0 : index
    %c0_45 = arith.constant 0 : index
    %31 = vector.load %arg3[%c0_44, %c0_45] : memref<8x16xf32, #tpu.memory_space<vmem>>, vector<8x16xf32>
    %cst_46 = arith.constant dense<0.000000e+00> : vector<8x8xf32>
    %32 = tpu.matmul %31, %30, %cst_46 {dimension_numbers = #tpu.dot_dimension_numbers<[1], [0], [0], [1], [0, 0, 1, 1], [], []>} : vector<8x16xf32>, vector<16x8xf32>, vector<8x8xf32> -> vector<8x8xf32>
    %c0_47 = arith.constant 0 : index
    %c3_48 = arith.constant 3 : index
    %c0_49 = arith.constant 0 : index
    %c0_50 = arith.constant 0 : index
    %33 = vector.load %arg5[%c0_47, %c3_48, %c0_49, %c0_50] : memref<1x4x8x8xf32, #tpu.memory_space<vmem>>, vector<1x1x8x8xf32>
    %34 = vector.shape_cast %33 : vector<1x1x8x8xf32> to vector<8x8xf32>
    %35 = vector.shape_cast %32 : vector<8x8xf32> to vector<1x1x8x8xf32>
    tpu.vector_store %arg5[%c0_47, %c3_48, %c0_49, %c0_50], %35 {strides = array<i32>} : memref<1x4x8x8xf32, #tpu.memory_space<vmem>>, vector<1x1x8x8xf32>,
    return
  }
  func.func @transform_0(%arg0: i32, %arg1: i32) -> (i32, i32, i32, i32) {
    %c0_i32 = arith.constant 0 : i32
    %c0_i32_0 = arith.constant 0 : i32
    %c0_i32_1 = arith.constant 0 : i32
    %c0_i32_2 = arith.constant 0 : i32
    return %arg0, %c0_i32, %c0_i32_0, %c0_i32_1 : i32, i32, i32, i32
  }
  func.func @transform_1(%arg0: i32, %arg1: i32) -> (i32, i32) {
    %c0_i32 = arith.constant 0 : i32
    %c0_i32_0 = arith.constant 0 : i32
    %c0_i32_1 = arith.constant 0 : i32
    return %c0_i32, %c0_i32_0 : i32, i32
  }
  func.func @transform_2(%arg0: i32, %arg1: i32) -> (i32, i32) {
    %c0_i32 = arith.constant 0 : i32
    %c0_i32_0 = arith.constant 0 : i32
    return %c0_i32, %arg1 : i32, i32
  }
  func.func @transform_3(%arg0: i32, %arg1: i32) -> (i32, i32, i32, i32) {
    %c0_i32 = arith.constant 0 : i32
    %c0_i32_0 = arith.constant 0 : i32
    %c0_i32_1 = arith.constant 0 : i32
    return %arg0, %c0_i32, %c0_i32_0, %arg1 : i32, i32, i32, i32
  }
}

</mosaic_0001>

<bundles_post_ra>
// kernel: tpu_custom_call.1
= control target key start
LH: loop header
LB: loop body
LE: loop exit
PB: predicated region body
PF: predicated region fallthrough
CT: control target
= control target key end

     0   :  { %8 = vsyncpa [#allocation3], 0  ;;  %s1496_s0 = inlined_call_operand.hbm [shape: f32[2,4,16,16], index: 0, kind: input, shape index: {}]   ;;  %s1497_s1 = inlined_call_operand.vmem [shape: f32[8,16], index: 1, kind: input, shape index: {}]   ;;  %s1498_s2 = inlined_call_operand.vmem [shape: f32[16,8], index: 2, kind: input, shape index: {}]   ;;  %s1499_s3 = inlined_call_operand.hbm [shape: f32[2,4,8,8], index: 3, kind: output, shape index: {}]  }
   0x1   :  { %10 = vsyncpa [#allocation3 + $0x1], 0 }
   0x2   :  { %11 = vsyncpa [#allocation4], 0 }
   0x3   :  { %13 = vsyncpa [#allocation4 + $0x1], 0  ;;  %s1310_s12 = smov 0   ;;  %s1312_s13 = smov 0  }
   0x4   :  { %s1314_s14 = smov 0   ;;  %s1316_s15 = smov 0  }
   0x5   :  { %s1318_s16 = smov 0   ;;  %s1320_s17 = smov 0  }
   0x6 LB: > { %s981_s18 = sadd.s32 4294967295, %s1280_s17   ;;  %s982_s19 = sadd.s32 4294967294, %s1280_s17   ;;  %s1280_s17 = sphi %s1320_s17, %s19_s17   ;;  %s1276_s16 = sphi %s1318_s16, %s1510_s16   ;;  %s1272_s15 = sphi %s1316_s15, %s1509_s15   ;;  %s1268_s14 = sphi %s1314_s14, %s1508_s14   ;;  %s1264_s13 = sphi %s1312_s13, %s1507_s13   ;;  %s1260_s12 = sphi %s1310_s12, %s1506_s12  }
   0x7   : > { %s31_s20 = sadd.s32 1, %s1276_s16  ;;  %s38_s21 = sadd.s32 1, %s1268_s14 }
   0x8   : > { %p33_p0 = scmp.ge.s32.totalorder %s31_s20, 2  ;;  %p45_p1 = scmp.ne.s32.totalorder %s1268_s14, %s1264_s13 }
   0x9   : > { %p46_p2 = scmp.eq.s32.totalorder %s1280_s17, 0  ;;  %p51_p3 = scmp.ne.s32.totalorder %s1264_s13, %s1260_s12 }
   0xa   : > { %s1512_s20 = smov (%p33_p0, %s31_s20), 0  ;;  %p52_p5 = scmp.eq.s32.totalorder %s981_s18, 0 }
   0xb   : > { %p1351_p4 = por %p46_p2, %p45_p1  ;;  %s35_s23 = ssub.s32 %s1276_s16, %s1512_s20 }
   0xc   : > { %p124_p6 = scmp.eq.s32.totalorder %s981_s18, 1  ;;  %p36_p7 = scmp.eq.s32.totalorder %s35_s23, 0 }
   0xd   : > { %p1357_p8 = por %p52_p5, %p51_p3  ;;  %p130_p10 = scmp.eq.s32.totalorder %s982_s19, 1 }
   0xe   : > { %p1361_p9 = por %p124_p6, %p45_p1  ;;  %p1116_p13 = scmp.lt.s32.totalorder %s1280_s17, 2 }
   0xf   : > { %s1366_s26 = scalar_select %p36_p7, %s1268_s14, %s38_s21  }
  0x10   : > { %p1368_p11 = por %p130_p10, %p51_p3  ;;  %s160_s28 = sand.u32 1, %s1268_s14  }
  0x11   : > { %s986_s29 = sshll.u32 %s160_s28, 6  ;;  %s1018_s30 = sshll.u32 %s1276_s16, 10 }
  0x12   : > { %s170_s6 = scalar_lea.hbm %s1496_s0, %s1018_s30  ;;  %s164_s7 = scalar_lea.vmem [#allocation2], %s986_s29 }
  0x13   : > { %s171_s8 = sshll.u32 %s164_s7, 4  ;;  %p1381_p0 = pnand %p1116_p13, %p1351_p4  ;;  %s172_s8 = int_to_ptr.vmem [resolvable:$true] %s171_s8 }
  0x14   : > { %p989_p1 = scmp.ge.s32.totalorder %s1280_s17, 1  ;;  %s161_s10 = scalar_lea.sflag [#allocation3], %s160_s28 }
  0x15   : > { %p1174_p2 = pneg %p1381_p0  ;;  %s1185_s11 = scalar_lea.vmem %s172_s8, 1024 }
  0x16   : > { %p1186_p3 = scmp.ne.s32.totalorder %s172_s8, %s1185_s11  ;;  %s1282_s18 = smov [#allocation2]  }
  0x17   : > { %s1190_s19 = sshll.u32 %s1282_s18, 4  ;;  %s1191_s19 = int_to_ptr.vmem [resolvable:$false] %s1190_s19 }
  0x18   : > { %p1188_p5 = pnand %p1186_p3, %p1174_p2  ;;  %s1192_s21 = scalar_lea.vmem %s1191_s19, 2048 }
  0x19   : > { %p1193_p7 = scmp.lt.s32.totalorder %s172_s8, %s1191_s19  ;;  %p1194_p10 = scmp.lt.s32.totalorder %s1192_s21, %s1185_s11 }
  0x1a   : > { %p1189_p6 = pneg %p1188_p5 }
  0x1b   : > { %p1195_p12 = por %p1194_p10, %p1193_p7 }
  0x1d   : > { %p1196_p4 = pnand %p1195_p12, %p1189_p6 }
  0x1f   : > { %1199 = shalt.err (!%p1196_p4)
}
  0x20   : > { %s1283_s22 = smov 128   ;;  %s1284_s23 = smov 8  }
  0x21   : > { %1111 = dma.hbm_to_vmem [thread:$0]  (!%p1381_p0), %s170_s6, 1024, %s172_s8, %s161_s10, %s1283_s22, %s1283_s22, %s1284_s23  }
  0x22   : > { %p179_p13 = scmp.lt.s32.totalorder %s1280_s17, 3 }
  0x24   : > { %p180_p2 = pnand %p989_p1, %p179_p13 }
  0x25   : > { %s1394_s28 = sand.u32 (!%p180_p2), 1, %s1264_s13  }
  0x26   : > { %183 = sbr.rel (%p180_p2) target bundleno = 465 (0x1d1), region = 32  ;;  %s990_s29 = sshll.u32 (!%p180_p2), %s1394_s28, 6 }
  0x27   : > { %s186_s30 = scalar_lea.sflag (!%p180_p2), [#allocation3], %s1394_s28  ;;  %s1398_s4 = scalar_lea.vmem (!%p180_p2), [#allocation2], %s990_s29 }
  0x2b   : > { %1251 = dma.done.wait (%p1357_p8), %s186_s30, 1024  }
  0x2c   : > { %1253 = vsyncadd (%p1357_p8), %s186_s30, 4294966272  ;;  %vm224_vm0 = vcmask 130048   ;;  %v223_v0 = vld [vmem:[%s1498_s2 + $0x8] sm:$0xff]  ;;  %v222_v1 = vld [vmem:[%s1498_s2] sm:$0xff]  ;;  %v1285_v10 = vmov 0.0   ;;  %vm1286_vm1 = vmmov 0  }
  0x2d   : > { %v220_v2 = vld [vmem:[%s1398_s4] sm:$0xff]  ;;  %1048 = vmatprep.subr.mxu0 %v223_v0  ;;  %v221_v3 = vld [vmem:[%s1398_s4 + $0x8] sm:$0xff]  ;;  %v995_v4 = vld [vmem:[%s1398_s4 + $0x10] sm:$0xff]  ;;  %1055 = vmatprep.subr.mxu1 %v1285_v10  ;;  %s991_s10 = sshll.u32 %s1394_s28, 5  ;;  %vm380_vm2 = vcmask 64512   ;;  %s1019_s19 = sshll.u32 %s1272_s15, 9 }
  0x2e   : > { %1052 = vmatprep.mubr.msk.f32.mxu0 %vm224_vm0, %v220_v2  ;;  %1049 = vmatpush3.msra.mxu0 %v223_v0  ;;  %v996_v5 = vld [vmem:[%s1398_s4 + $0x18] sm:$0xff]  ;;  %v1001_v6 = vld [vmem:[%s1398_s4 + $0x20] sm:$0xff]  ;;  %v1002_v7 = vld [vmem:[%s1398_s4 + $0x28] sm:$0xff]  ;;  %s215_s11 = scalar_lea.vmem [#allocation5], %s991_s10  ;;  %s1447_s23 = scalar_lea.hbm %s1499_s3, %s1019_s19 }
  0x2f   : > { %1050 = vmatprep.subr.mxu0 %v222_v1  ;;  %v1007_v8 = vld [vmem:[%s1398_s4 + $0x30] sm:$0xff]  ;;  %v1008_v9 = vld [vmem:[%s1398_s4 + $0x38] sm:$0xff]  ;;  %1059 = vmatprep.mubr.msk.f32.mxu1 %vm1286_vm1, %v1285_v10  ;;  %v306_v12 = vld [vmem:[%s1497_s1] sm:$0xff]  ;;  %s883_s18 = sshll.u32 %s215_s11, 4  ;;  %s869_s29 = scalar_lea.sflag [#allocation4], %s1394_s28  ;;  %s1441_s18 = int_to_ptr.vmem [resolvable:$true] %s883_s18 }
  0x30   : > { %1051 = vmatpush3.msra.mxu0 %v222_v1  ;;  %s1200_s15 = scalar_lea.vmem %s1441_s18, 512  ;;  %s1287_s30 = smov [#allocation5]  }
  0x31   : > { %1053 = vmatmul.mubr.msk.f32.vlgmr.msra.gmra.mxu0 %vm224_vm0, %v221_v3  ;;  %1062 = vmatprep.subr.mxu0 %v223_v0  ;;  %p1201_p8 = scmp.ne.s32.totalorder %s1441_s18, %s1200_s15  ;;  %s1204_s4 = sshll.u32 %s1287_s30, 4  ;;  %s1205_s4 = int_to_ptr.vmem [resolvable:$false] %s1204_s4 }
  0x32   : > { %1063 = vmatpush3.msra.mxu0 %v223_v0  ;;  %1066 = vmatprep.mubr.msk.f32.mxu0 %vm224_vm0, %v995_v4  ;;  %s1206_s5 = scalar_lea.vmem %s1205_s4, 1024  ;;  %p1207_p1 = scmp.lt.s32.totalorder %s1441_s18, %s1205_s4 }
  0x33   : > { %1064 = vmatprep.subr.mxu0 %v222_v1  ;;  %p1202_p12 = pnand %p1201_p8, %p1361_p9  ;;  %p1208_p3 = scmp.lt.s32.totalorder %s1206_s5, %s1200_s15 }
  0x34   : > { %1065 = vmatpush3.msra.mxu0 %v222_v1 }
  0x35   : > { %1067 = vmatmul.mubr.msk.f32.vlgmr.msra.gmra.mxu0 %vm224_vm0, %v996_v5  ;;  %1076 = vmatprep.subr.mxu0 %v223_v0  ;;  %p1203_p0 = pneg %p1202_p12  ;;  %p1209_p5 = por %p1208_p3, %p1207_p1 }
  0x36   : > { %1077 = vmatpush3.msra.mxu0 %v223_v0  ;;  %1080 = vmatprep.mubr.msk.f32.mxu0 %vm224_vm0, %v1001_v6 }
  0x37   : > { %1078 = vmatprep.subr.mxu0 %v222_v1  ;;  %p1210_p6 = pnand %p1209_p5, %p1203_p0 }
  0x38   : > { %1079 = vmatpush3.msra.mxu0 %v222_v1 }
  0x39   : > { %1081 = vmatmul.mubr.msk.f32.vlgmr.msra.gmra.mxu0 %vm224_vm0, %v1002_v7  ;;  %1090 = vmatprep.subr.mxu0 %v223_v0 }
  0x3a   : > { %1091 = vmatpush3.msra.mxu0 %v223_v0  ;;  %1094 = vmatprep.mubr.msk.f32.mxu0 %vm224_vm0, %v1007_v8 }
  0x3b   : > { %1092 = vmatprep.subr.mxu0 %v222_v1 }
  0x3c   : > { %1093 = vmatpush3.msra.mxu0 %v222_v1 }
  0x3d   : > { %1095 = vmatmul.mubr.msk.f32.vlgmr.msra.gmra.mxu0 %vm224_vm0, %v1008_v9 }
  0xf1   : > { %v1054_v11 = vpop.f32.mrf.mxu0 }
  0xf2   : > { %1056 = vmatpush3.msra.mxu1 %v1054_v11 }
  0xf3   : > { %v297_v13 = vpop.f32.mrf.mxu0  ;;  %1057 = vmatprep.subr.mxu1 %v1285_v10 }
  0xf4   : > { %1058 = vmatpush3.msra.mxu1 %v297_v13 }
  0xf5   : > { %1060 = vmatmul.mubr.msk.f32.vlgmr.msra.gmra.mxu1 %vm224_vm0, %v306_v12  ;;  %v1068_v14 = vpop.f32.mrf.mxu0  ;;  %1069 = vmatprep.subr.mxu1 %v1285_v10 }
  0xf6   : > { %1070 = vmatpush3.msra.mxu1 %v1068_v14  ;;  %1073 = vmatprep.mubr.msk.f32.mxu1 %vm1286_vm1, %v1285_v10 }
  0xf7   : > { %v459_v15 = vpop.f32.mrf.mxu0  ;;  %1071 = vmatprep.subr.mxu1 %v1285_v10 }
  0xf8   : > { %1072 = vmatpush3.msra.mxu1 %v459_v15 }
  0xf9   : > { %1074 = vmatmul.mubr.msk.f32.vlgmr.msra.gmra.mxu1 %vm224_vm0, %v306_v12  ;;  %v1082_v16 = vpop.f32.mrf.mxu0  ;;  %1083 = vmatprep.subr.mxu1 %v1285_v10 }
  0xfa   : > { %1084 = vmatpush3.msra.mxu1 %v1082_v16  ;;  %1087 = vmatprep.mubr.msk.f32.mxu1 %vm1286_vm1, %v1285_v10 }
  0xfb   : > { %v621_v17 = vpop.f32.mrf.mxu0  ;;  %1085 = vmatprep.subr.mxu1 %v1285_v10 }
  0xfc   : > { %1086 = vmatpush3.msra.mxu1 %v621_v17 }
  0xfd   : > { %1088 = vmatmul.mubr.msk.f32.vlgmr.msra.gmra.mxu1 %vm224_vm0, %v306_v12  ;;  %v1096_v18 = vpop.f32.mrf.mxu0  ;;  %1097 = vmatprep.subr.mxu1 %v1285_v10 }
  0xfe   : > { %1098 = vmatpush3.msra.mxu1 %v1096_v18  ;;  %1101 = vmatprep.mubr.msk.f32.mxu1 %vm1286_vm1, %v1285_v10 }
  0xff   : > { %v783_v19 = vpop.f32.mrf.mxu0  ;;  %1099 = vmatprep.subr.mxu1 %v1285_v10 }
 0x100   : > { %1100 = vmatpush3.msra.mxu1 %v783_v19 }
 0x101   : > { %1102 = vmatmul.mubr.msk.f32.vlgmr.msra.gmra.mxu1 %vm224_vm0, %v306_v12 }
 0x1b5   : > { %v376_v20 = vpop.f32.mrf.mxu1 }
 0x1b6   : > { %381 = vst.msk [vmem:[%s215_s11] sm:$0xff] %vm380_vm2, %v376_v20 }
 0x1b7   : > { %v1061_v21 = vpop.f32.mrf.mxu1 }
 0x1b9   : > { %v538_v22 = vpop.f32.mrf.mxu1 }
 0x1ba   : > { %1000 = vst.msk [vmem:[%s215_s11 + $0x8] sm:$0xff] %vm380_vm2, %v538_v22 }
 0x1bb   : > { %v1075_v23 = vpop.f32.mrf.mxu1 }
 0x1bd   : > { %v700_v24 = vpop.f32.mrf.mxu1 }
 0x1be   : > { %1006 = vst.msk [vmem:[%s215_s11 + $0x10] sm:$0xff] %vm380_vm2, %v700_v24 }
 0x1bf   : > { %v1089_v25 = vpop.f32.mrf.mxu1 }
 0x1c1   : > { %v862_v26 = vpop.f32.mrf.mxu1 }
 0x1c2   : > { %1012 = vst.msk [vmem:[%s215_s11 + $0x18] sm:$0xff] %vm380_vm2, %v862_v26 }
 0x1c3   : > { %v1103_v27 = vpop.f32.mrf.mxu1 }
 0x1c4   : > { %1213 = shalt.err (!%p1210_p6)
}
 0x1c5   : > { %s1214_s6 = scalar_lea.hbm %s1447_s23, 512  ;;  %s1218_s24 = scalar_lea.hbm %s1499_s3, 1024 }
 0x1c6   : > { %p1215_p7 = scmp.ne.s32.totalorder %s1447_s23, %s1214_s6  ;;  %p1219_p13 = scmp.lt.s32.totalorder %s1447_s23, %s1499_s3 }
 0x1c7   : > { %p1220_p2 = scmp.lt.s32.totalorder %s1218_s24, %s1214_s6 }
 0x1c8   : > { %p1216_p10 = pnand %p1215_p7, %p1361_p9 }
 0x1c9   : > { %p1221_p8 = por %p1220_p2, %p1219_p13 }
 0x1ca   : > { %p1217_p4 = pneg %p1216_p10 }
 0x1cc   : > { %p1222_p12 = pnand %p1221_p8, %p1217_p4 }
 0x1ce   : > { %1225 = shalt.err (!%p1222_p12)
}
 0x1cf   : > { %s1288_s11 = smov 128   ;;  %s1289_s19 = smov 8  }
 0x1d0   : > { %1106 = dma.vmem_to_hbm [thread:$0]  (%p1361_p9), %s1441_s18, 512, %s1447_s23, %s869_s29, %s1288_s11, %s1288_s11, %s1289_s19  }
 0x1d1 PF: > { %s898_s21 = sand.u32 1, %s1260_s12   ;;  %p1505_p0 = scmp.ge.s32.totalorder %s1280_s17, 2 }
 0x1d2   : > { %s899_s22 = scalar_lea.sflag [#allocation4], %s898_s21 }
 0x1d3   : > { %p1113_p1 = pnand %p1505_p0, %p1368_p11 }
 0x1d5   : > { %p1114_p3 = pneg %p1113_p1 }
 0x1d7   : > { %1255 = dma.done.wait (%p1114_p3), %s899_s22, 512  }
 0x1d8   : > { %1257 = vsyncadd (%p1114_p3), %s899_s22, 4294966784  ;;  %s19_s17 = sadd.s32 1, %s1280_s17   ;;  %s1506_s12 = smov %s1264_s13 }
 0x1d9   : > { %p16_p5 = scmp.ge.s32.totalorder %s19_s17, 4   ;;  %s1507_s13 = smov %s1268_s14 }
 0x1da   : > { %s1508_s14 = smov %s1366_s26  ;;  %s1509_s15 = smov %s1276_s16 }
 0x1db   : > { %s1510_s16 = smov %s1512_s20  ;;  %18 = sbr.rel (!%p16_p5) target bundleno = 6 (0x6), region = 86 }
 0x1e0   :  { %904 = vsyncpa [#allocation3], 1 }
 0x1e1   :  { %906 = vsyncpa [#allocation3 + $0x1], 1 }
 0x1e2   :  { %907 = vsyncpa [#allocation4], 1 }
 0x1e3   :  { %909 = vsyncpa [#allocation4 + $0x1], 1 }

</bundles_post_ra>
